<compile_context>
chip_gen: v7x
topology: tpu7x:2x2x1
jax: 0.10.0
libtpu: 0.0.40
codegen_flags: <defaults>
</compile_context>

<pallas_src>
import jax
import jax.numpy as jnp
from jax import lax
from jax.experimental import pallas as pl
from jax.experimental.pallas import tpu as pltpu

_EPS = 1e-12  # F.normalize default eps


def _round_up(a, m):
    return (a + m - 1) // m * m


def _vmem_limit_bytes():
    """Per-generation VMEM budget: ~3/4 of physical, capped at 100 MiB."""
    cap = None
    try:
        info = pltpu.get_tpu_info()
        cap = getattr(info, "vmem_capacity_bytes", None)
    except Exception:
        cap = None
    if not cap:
        cap = 64 * 1024 * 1024  # conservative fallback (v7x per-TC VMEM)
    return min(int(cap) * 3 // 4, 100 * 1024 * 1024)


def _choose_tiles(Bp, Cp, Dp, budget):
    """Pick (tb, tc, tk) that fit the VMEM budget (double-buffered pipeline)."""

    def fits(tb, tc, tk):
        x_buf = 2 * tb * tk * 4        # f32 x tiles (double-buffered)
        w_buf = 2 * tc * tk * 2        # bf16 pre-normalized weight tiles
        o_buf = 2 * tb * tc * 4        # output tiles
        acc = tb * tc * 4              # f32 accumulator scratch
        xinv = 2 * tb * 128 * 4        # lane-padded (tb, 1) inverse-norm block
        # ~2x headroom for in-kernel temporaries (xn bf16, casts, clip).
        return 2 * (x_buf + w_buf + o_buf + acc + xinv) <= budget

    tb = min(512, Bp)
    tc = min(512, Cp)
    tk = min(2048, Dp)
    # Shrink the contraction tile first (K-tiling keeps VMEM independent of D),
    # then the batch tile, then the class tile.
    while not fits(tb, tc, tk) and tk > 128:
        tk = max(128, _round_up(tk // 2, 128))
    while not fits(tb, tc, tk) and tb > 8:
        tb = max(8, _round_up(tb // 2, 8))
    while not fits(tb, tc, tk) and tc > 128:
        tc = max(128, _round_up(tc // 2, 128))
    return tb, tc, tk


def _angular_linear_kernel(x_ref, xinv_ref, w_ref, o_ref, acc_ref):
    # x tile: (tb, tk)  xinv tile: (tb, 1) f32  w tile: (tc, tk) bf16 (pre-normalized)
    k = pl.program_id(2)

    @pl.when(k == 0)
    def _():
        acc_ref[...] = jnp.zeros_like(acc_ref)

    # Apply the precomputed per-row inverse L2 norm (broadcast multiply) and
    # cast to bf16 for the MXU; the squares/reduce were hoisted to the wrapper.
    xn = (x_ref[...].astype(jnp.float32) * xinv_ref[...]).astype(jnp.bfloat16)

    # Cosine logits on the MXU: contract the LAST dims of both operands so the
    # row-major weight tile feeds the MXU directly (no transpose). f32 accumulate.
    acc_ref[...] += lax.dot_general(
        xn, w_ref[...],
        dimension_numbers=(((1,), (1,)), ((), ())),
        preferred_element_type=jnp.float32)

    @pl.when(k == pl.num_programs(2) - 1)
    def _():
        o_ref[...] = jnp.clip(acc_ref[...], -1.0, 1.0).astype(o_ref.dtype)


def angular_linear(x, weight, *, tb=None, tc=None, tk=None):
    """x: (B, ...) arbitrary trailing dims; weight: (out_features, in_features)."""
    B = x.shape[0]
    x2 = x.reshape(B, -1)                      # torch .view(B, -1)
    C, D = weight.shape
    assert x2.shape[1] == D, f"in_features mismatch: {x2.shape[1]} vs {D}"
    out_dtype = x.dtype

    # Lane/sublane-aligned padded shapes (zero padding changes neither the row
    # norms nor the dot products; padded output rows/cols are sliced off).
    Bp = _round_up(B, 8)
    Cp = _round_up(C, 128)
    Dp = _round_up(D, 128)

    budget = _vmem_limit_bytes()
    tb_a, tc_a, tk_a = _choose_tiles(Bp, Cp, Dp, budget)
    tb = tb_a if tb is None else min(tb, Bp)
    tc = tc_a if tc is None else min(tc, Cp)
    tk = tk_a if tk is None else min(tk, Dp)
    Bp = _round_up(Bp, tb)
    Cp = _round_up(Cp, tc)
    Dp = _round_up(Dp, tk)

    # --- one fused wrapper pass over x: row inverse-norms + padding ------------
    x_f32 = x2.astype(jnp.float32)
    x_inv = lax.rsqrt(jnp.maximum(jnp.sum(x_f32 * x_f32, axis=1, keepdims=True),
                                  _EPS * _EPS))
    x_pad = x2 if (Bp, Dp) == (B, D) else jnp.pad(x2, ((0, Bp - B), (0, Dp - D)))
    if Bp != B:
        x_inv = jnp.pad(x_inv, ((0, Bp - B), (0, 0)))   # padded rows -> xn = 0

    # --- one fused wrapper pass over the weight: normalize + bf16 + pad --------
    # For a static classifier head this pre-normalized bf16 weight can be
    # computed once and cached by the caller across forward passes.
    w_f32 = weight.astype(jnp.float32)
    w_inv = lax.rsqrt(jnp.maximum(jnp.sum(w_f32 * w_f32, axis=1, keepdims=True),
                                  _EPS * _EPS))
    w_norm = (w_f32 * w_inv).astype(jnp.bfloat16)
    if (Cp, Dp) != (C, D):
        w_norm = jnp.pad(w_norm, ((0, Cp - C), (0, Dp - D)))

    grid = (Bp // tb, Cp // tc, Dp // tk)

    out_p = pl.pallas_call(
        _angular_linear_kernel,
        out_shape=jax.ShapeDtypeStruct((Bp, Cp), out_dtype),
        grid_spec=pltpu.PrefetchScalarGridSpec(
            num_scalar_prefetch=0,
            grid=grid,
            in_specs=[
                pl.BlockSpec((tb, tk), lambda i, j, k: (i, k)),   # x tile
                pl.BlockSpec((tb, 1), lambda i, j, k: (i, 0)),    # x inverse norms
                pl.BlockSpec((tc, tk), lambda i, j, k: (j, k)),   # bf16 normalized W
            ],
            out_specs=pl.BlockSpec((tb, tc), lambda i, j, k: (i, j)),
            scratch_shapes=[pltpu.VMEM((tb, tc), jnp.float32)],
        ),
        compiler_params=pltpu.CompilerParams(
            dimension_semantics=("parallel", "parallel", "arbitrary"),
            vmem_limit_bytes=budget,
        ),
    )(x_pad, x_inv, w_norm)

    return out_p[:B, :C]


def init_angular_weight(key, out_features, in_features, dtype=jnp.float32):
    """Deterministic init matching: normal_().renorm_(2, 0, 1e-05).mul_(1e5)."""
    w = jax.random.normal(key, (out_features, in_features), dtype=jnp.float32)
    maxnorm = 1e-5
    norms = jnp.linalg.norm(w, axis=1, keepdims=True)
    # torch.renorm: rows with norm > maxnorm scaled by maxnorm / (norm + 1e-7)
    scale = jnp.where(norms > maxnorm, maxnorm / (norms + 1e-7), 1.0)
    w = w * scale * 1e5
    return w.astype(dtype)


def _reference(x, weight):
    B = x.shape[0]
    x2 = x.reshape(B, -1).astype(jnp.float32)
    w = weight.astype(jnp.float32)
    xn = x2 / jnp.maximum(jnp.linalg.norm(x2, axis=1, keepdims=True), _EPS)
    wn = w / jnp.maximum(jnp.linalg.norm(w, axis=1, keepdims=True), _EPS)
    return jnp.clip(xn @ wn.T, -1.0, 1.0)


if __name__ == "__main__":
    key = jax.random.PRNGKey(0)
    k_x1, k_w1, k_x2, k_w2, k_x3, k_w3 = jax.random.split(key, 6)

    # Case 1: aligned feature map (2, 4, 8, 8) -> D = 256, 16 classes.
    B, Cc, Hh, Ww = 2, 4, 8, 8
    in_features, out_features = Cc * Hh * Ww, 16
    x1 = jax.random.normal(k_x1, (B, Cc, Hh, Ww), dtype=jnp.float32)
    w1 = init_angular_weight(k_w1, out_features, in_features)

    out1 = jax.block_until_ready(angular_linear(x1, w1))
    ref1 = _reference(x1, w1)
    assert out1.shape == (B, out_features)
    # bf16 MXU operands -> looser tolerance vs the f32 reference.
    assert jnp.allclose(out1, ref1, atol=2e-2), "case 1 mismatch vs reference"
    assert jnp.all(out1 <= 1.0) and jnp.all(out1 >= -1.0)

    # Case 2: unaligned shapes to exercise the padding path
    # (B=3, D = 5*7*7 = 245, 10 classes).
    B2, C2, H2, W2 = 3, 5, 7, 7
    in2, outc2 = C2 * H2 * W2, 10
    x2 = jax.random.normal(k_x2, (B2, C2, H2, W2), dtype=jnp.float32)
    w2 = init_angular_weight(k_w2, outc2, in2)

    out2 = jax.block_until_ready(angular_linear(x2, w2))
    ref2 = _reference(x2, w2)
    assert out2.shape == (B2, outc2)
    assert jnp.allclose(out2, ref2, atol=2e-2), "case 2 mismatch vs reference"

    # Case 3: force small tiles to exercise multi-block grid on all three axes
    # (B-tiles, C-tiles) and the K-tiled accumulator path (3 K steps).
    B3, in3, outc3 = 20, 384, 200
    x3 = jax.random.normal(k_x3, (B3, in3), dtype=jnp.float32)
    w3 = init_angular_weight(k_w3, outc3, in3)

    out3 = jax.block_until_ready(angular_linear(x3, w3, tb=8, tc=128, tk=128))
    ref3 = _reference(x3, w3)
    assert out3.shape == (B3, outc3)
    assert jnp.allclose(out3, ref3, atol=2e-2), "case 3 mismatch vs reference"

    print("KERNEL_OK")
</pallas_src>

<mosaic_0001>
module attributes {stable_mosaic.version = 11 : i64} {
  func.func @_angular_linear_kernel(%arg0: i32, %arg1: i32, %arg2: i32, %arg3: memref<8x256xf32, #tpu.memory_space<vmem>>, %arg4: memref<8x1xf32, #tpu.memory_space<vmem>>, %arg5: memref<128x256xbf16, #tpu.memory_space<vmem>>, %arg6: memref<8x128xf32, #tpu.memory_space<vmem>>, %arg7: memref<8x128xf32, #tpu.memory_space<vmem>>) attributes {dimension_semantics = [#tpu.dimension_semantics<parallel>, #tpu.dimension_semantics<parallel>, #tpu.dimension_semantics<arbitrary>], iteration_bounds = array<i64: 1, 1, 1>, scalar_prefetch = 0 : i64, scratch_operands = 1 : i64, tpu.core_type = #tpu.core_type<tc>, window_params = [{transform_indices = @transform_0, window_bounds = array<i64: 8, 256>}, {transform_indices = @transform_1, window_bounds = array<i64: 8, 1>}, {transform_indices = @transform_2, window_bounds = array<i64: 128, 256>}, {transform_indices = @transform_3, window_bounds = array<i64: 8, 128>}]} {
    %c0_i32 = arith.constant 0 : i32
    %0 = arith.cmpi eq, %arg2, %c0_i32 : i32
    %1 = arith.extui %0 : i1 to i32
    %c0_i32_0 = arith.constant 0 : i32
    %2 = arith.cmpi ne, %1, %c0_i32_0 : i32
    scf.if %2 {
      %cst_12 = arith.constant 0.000000e+00 : f32
      %16 = vector.broadcast %cst_12 : f32 to vector<8x128xf32>
      %c0_13 = arith.constant 0 : index
      %c0_14 = arith.constant 0 : index
      %17 = vector.load %arg7[%c0_13, %c0_14] : memref<8x128xf32, #tpu.memory_space<vmem>>, vector<8x128xf32>
      tpu.vector_store %arg7[%c0_13, %c0_14], %16 {strides = array<i32>} : memref<8x128xf32, #tpu.memory_space<vmem>>, vector<8x128xf32>,
    } else {
    }
    %c0 = arith.constant 0 : index
    %c0_1 = arith.constant 0 : index
    %3 = vector.load %arg3[%c0, %c0_1] : memref<8x256xf32, #tpu.memory_space<vmem>>, vector<8x256xf32>
    %c0_2 = arith.constant 0 : index
    %c0_3 = arith.constant 0 : index
    %4 = vector.load %arg4[%c0_2, %c0_3] : memref<8x1xf32, #tpu.memory_space<vmem>>, vector<8x1xf32>
    %5 = vector.broadcast %4 : vector<8x1xf32> to vector<8x256xf32>
    %6 = arith.mulf %3, %5 : vector<8x256xf32>
    %7 = arith.truncf %6 : vector<8x256xf32> to vector<8x256xbf16>
    %c0_4 = arith.constant 0 : index
    %c0_5 = arith.constant 0 : index
    %8 = vector.load %arg7[%c0_4, %c0_5] : memref<8x128xf32, #tpu.memory_space<vmem>>, vector<8x128xf32>
    %c0_6 = arith.constant 0 : index
    %c0_7 = arith.constant 0 : index
    %9 = vector.load %arg5[%c0_6, %c0_7] : memref<128x256xbf16, #tpu.memory_space<vmem>>, vector<128x256xbf16>
    %cst = arith.constant dense<0.000000e+00> : vector<8x128xf32>
    %10 = tpu.matmul %7, %9, %cst {dimension_numbers = #tpu.dot_dimension_numbers<[1], [1], [0], [0], [0, 0, 1, 0], [], []>} : vector<8x256xbf16>, vector<128x256xbf16>, vector<8x128xf32> -> vector<8x128xf32>
    %11 = arith.addf %8, %10 : vector<8x128xf32>
    %c0_8 = arith.constant 0 : index
    %c0_9 = arith.constant 0 : index
    %12 = vector.load %arg7[%c0_8, %c0_9] : memref<8x128xf32, #tpu.memory_space<vmem>>, vector<8x128xf32>
    tpu.vector_store %arg7[%c0_8, %c0_9], %11 {strides = array<i32>} : memref<8x128xf32, #tpu.memory_space<vmem>>, vector<8x128xf32>,
    %c0_i32_10 = arith.constant 0 : i32
    %13 = arith.cmpi eq, %arg2, %c0_i32_10 : i32
    %14 = arith.extui %13 : i1 to i32
    %c0_i32_11 = arith.constant 0 : i32
    %15 = arith.cmpi ne, %14, %c0_i32_11 : i32
    scf.if %15 {
      %c0_12 = arith.constant 0 : index
      %c0_13 = arith.constant 0 : index
      %16 = vector.load %arg7[%c0_12, %c0_13] : memref<8x128xf32, #tpu.memory_space<vmem>>, vector<8x128xf32>
      %cst_14 = arith.constant -1.000000e+00 : f32
      %cst_15 = arith.constant 1.000000e+00 : f32
      %17 = vector.broadcast %cst_14 : f32 to vector<8x128xf32>
      %18 = arith.maximumf %17, %16 : vector<8x128xf32>
      %19 = vector.broadcast %cst_15 : f32 to vector<8x128xf32>
      %20 = arith.minimumf %19, %18 : vector<8x128xf32>
      %c0_16 = arith.constant 0 : index
      %c0_17 = arith.constant 0 : index
      %21 = vector.load %arg6[%c0_16, %c0_17] : memref<8x128xf32, #tpu.memory_space<vmem>>, vector<8x128xf32>
      tpu.vector_store %arg6[%c0_16, %c0_17], %20 {strides = array<i32>} : memref<8x128xf32, #tpu.memory_space<vmem>>, vector<8x128xf32>,
    } else {
    }
    return
  }
  func.func @transform_0(%arg0: i32, %arg1: i32, %arg2: i32) -> (i32, i32) {
    %c0_i32 = arith.constant 0 : i32
    return %arg0, %arg2 : i32, i32
  }
  func.func @transform_1(%arg0: i32, %arg1: i32, %arg2: i32) -> (i32, i32) {
    %c0_i32 = arith.constant 0 : i32
    %c0_i32_0 = arith.constant 0 : i32
    return %arg0, %c0_i32 : i32, i32
  }
  func.func @transform_2(%arg0: i32, %arg1: i32, %arg2: i32) -> (i32, i32) {
    %c0_i32 = arith.constant 0 : i32
    return %arg1, %arg2 : i32, i32
  }
  func.func @transform_3(%arg0: i32, %arg1: i32, %arg2: i32) -> (i32, i32) {
    %c0_i32 = arith.constant 0 : i32
    return %arg0, %arg1 : i32, i32
  }
}

</mosaic_0001>

<bundles_post_ra>
// kernel: tpu_custom_call.1
= control target key start
LH: loop header
LB: loop body
LE: loop exit
PB: predicated region body
PF: predicated region fallthrough
CT: control target
= control target key end

     0   :  { %8 = vsyncpa [#allocation4], 0  ;;  %s413_s0 = inlined_call_operand.hbm [shape: f32[8,256], index: 0, kind: input, shape index: {}]   ;;  %s414_s1 = inlined_call_operand.vmem [shape: f32[8,1], index: 1, kind: input, shape index: {}]   ;;  %s415_s2 = inlined_call_operand.hbm [shape: bf16[128,256], index: 2, kind: input, shape index: {}]   ;;  %s416_s3 = inlined_call_operand.hbm [shape: f32[8,128], index: 3, kind: output, shape index: {}]  }
   0x1   :  { %9 = vsyncpa [#allocation7], 0 }
   0x2   :  { %10 = vsyncpa [#allocation5], 0  ;;  %s341_s12 = smov [#allocation3]   ;;  %s342_s14 = smov [#allocation6]  }
   0x3   :  { %s17_s13 = sshll.u32 %s341_s12, 4  ;;  %s28_s15 = sshll.u32 %s342_s14, 4  ;;  %s18_s13 = int_to_ptr.vmem [resolvable:$true] %s17_s13  ;;  %s367_s15 = int_to_ptr.vmem [resolvable:$true] %s28_s15 }
   0x4   :  { %s269_s18 = scalar_lea.hbm %s413_s0, 256 }
   0x5   :  { %p270_p0 = scmp.ne.s32.totalorder %s413_s0, %s269_s18  ;;  %p273_p1 = scmp.lt.u32.totalorder %s269_s18, %s413_s0 }
   0x7   :  { %p275_p2 = pnand %p273_p1, %p270_p0 }
   0x9   :  { %278 = shalt.err (!%p275_p2)
}
   0xa   :  { %s279_s23 = scalar_lea.vmem %s18_s13, 256  ;;  %p284_p4 = scmp.lt.s32.totalorder %s18_s13, %s18_s13 }
   0xb   :  { %p280_p3 = scmp.ne.s32.totalorder %s18_s13, %s279_s23  ;;  %p285_p5 = scmp.lt.s32.totalorder %s279_s23, %s279_s23 }
   0xd   :  { %p286_p6 = por %p285_p5, %p284_p4 }
   0xf   :  { %p287_p7 = pnand %p286_p6, %p280_p3 }
  0x11   :  { %290 = shalt.err (!%p287_p7)
}
  0x12   :  { %20 = dma.hbm_to_vmem [thread:$0]  %s413_s0, 256, %s18_s13, [#allocation4]  }
  0x13   :  { %s291_s28 = scalar_lea.hbm %s415_s2, 2048 }
  0x14   :  { %p292_p8 = scmp.ne.s32.totalorder %s415_s2, %s291_s28  ;;  %p295_p9 = scmp.lt.u32.totalorder %s291_s28, %s415_s2 }
  0x16   :  { %p297_p10 = pnand %p295_p9, %p292_p8 }
  0x18   :  { %300 = shalt.err (!%p297_p10)
}
  0x19   :  { %s301_s6 = scalar_lea.vmem %s367_s15, 2048  ;;  %p306_p12 = scmp.lt.s32.totalorder %s367_s15, %s367_s15 }
  0x1a   :  { %p302_p11 = scmp.ne.s32.totalorder %s367_s15, %s301_s6  ;;  %p307_p13 = scmp.lt.s32.totalorder %s301_s6, %s301_s6 }
  0x1c   :  { %p308_p0 = por %p307_p13, %p306_p12 }
  0x1e   :  { %p309_p1 = pnand %p308_p0, %p302_p11 }
  0x20   :  { %312 = shalt.err (!%p309_p1)
}
  0x21   :  { %s343_s0 = smov 128   ;;  %s344_s7 = smov 8  }
  0x22   :  { %34 = dma.hbm_to_vmem [thread:$0]  %s415_s2, 2048, %s367_s15, [#allocation7], %s343_s0, %s343_s0, %s344_s7  }
  0x23   :  { %335 = dma.done.wait [#allocation4], 256  }
  0x24   :  { %336 = vsyncadd [#allocation4], 4294967040 }
  0x25   :  { %337 = dma.done.wait [#allocation7], 2048  }
  0x26   :  { %338 = vsyncadd [#allocation7], 4294965248  ;;  %v345_v0 = vmov 0   ;;  %v49_v1 = vld [vmem:[%s414_s1] sm:$0xff]  ;;  %v245_v2 = vld [vmem:[#allocation6 + $0x4] ss:$8 sps:$4 sm:$0xff]  }
  0x27   :  { %244 = vset.pattern.permute.xlu0 %v345_v0  ;;  %v247_v3 = vld [vmem:[#allocation6] ss:$8 sps:$4 sm:$0xff]   ;;  %v248_v4 = vld [vmem:[#allocation6 + $0x14] ss:$8 sps:$4 sm:$0xff]   ;;  %156 = vmatprep.subr.bf16.mxu0 %v245_v2  ;;  %v250_v5 = vld [vmem:[#allocation6 + $0x10] ss:$8 sps:$4 sm:$0xff]  }
  0x28   :  { %52 = vperm.xlu0 %244, %v49_v1   ;;  %157 = vmatpush1.bf16.xpose.msra.mxu0 %v247_v3  ;;  %v251_v6 = vld [vmem:[#allocation6 + $0x24] ss:$8 sps:$4 sm:$0xff]   ;;  %v253_v7 = vld [vmem:[#allocation6 + $0x20] ss:$8 sps:$4 sm:$0xff]   ;;  %v254_v8 = vld [vmem:[#allocation6 + $0x34] ss:$8 sps:$4 sm:$0xff]  }
  0x29   :  { %158 = vmatprep.subr.bf16.mxu0 %v248_v4  ;;  %v256_v9 = vld [vmem:[#allocation6 + $0x30] ss:$8 sps:$4 sm:$0xff]   ;;  %v257_v10 = vld [vmem:[#allocation6 + $0x44] ss:$8 sps:$4 sm:$0xff]   ;;  %v259_v11 = vld [vmem:[#allocation6 + $0x40] ss:$8 sps:$4 sm:$0xff]  }
  0x2a   :  { %v260_v12 = vld [vmem:[#allocation6 + $0x54] ss:$8 sps:$4 sm:$0xff]   ;;  %v262_v13 = vld [vmem:[#allocation6 + $0x50] ss:$8 sps:$4 sm:$0xff]   ;;  %v263_v14 = vld [vmem:[#allocation6 + $0x64] ss:$8 sps:$4 sm:$0xff]  }
  0x2b   :  { %v265_v15 = vld [vmem:[#allocation6 + $0x60] ss:$8 sps:$4 sm:$0xff]   ;;  %v266_v16 = vld [vmem:[#allocation6 + $0x74] ss:$8 sps:$4 sm:$0xff]   ;;  %v268_v17 = vld [vmem:[#allocation6 + $0x70] ss:$8 sps:$4 sm:$0xff]  }
  0x2c   :  { %v47_v18 = vld [vmem:[#allocation3] sm:$0xff]  ;;  %v48_v19 = vld [vmem:[#allocation3 + $0x8] sm:$0xff]  ;;  %s346_s1 = smov [#allocation8]  }
  0x2d   :  { %s211_s2 = sshll.u32 %s346_s1, 4  ;;  %s212_s2 = int_to_ptr.vmem [resolvable:$true] %s211_s2 }
  0x2e   :  { %s313_s12 = scalar_lea.vmem %s212_s2, 128  ;;  %p318_p3 = scmp.lt.s32.totalorder %s212_s2, %s212_s2 }
  0x2f   :  { %p314_p2 = scmp.ne.s32.totalorder %s212_s2, %s313_s12  ;;  %p319_p4 = scmp.lt.s32.totalorder %s313_s12, %s313_s12 }
  0x30   :  { %159 = vmatpush1.bf16.xpose.msra.mxu0 %v250_v5 }
  0x31   :  { %160 = vmatprep.subr.bf16.mxu0 %v251_v6  ;;  %p320_p5 = por %p319_p4, %p318_p3 }
  0x33   :  { %p321_p6 = pnand %p320_p5, %p314_p2 }
  0x38   :  { %161 = vmatpush1.bf16.xpose.msra.mxu0 %v253_v7 }
  0x39   :  { %162 = vmatprep.subr.bf16.mxu0 %v254_v8 }
  0x40   :  { %163 = vmatpush1.bf16.xpose.msra.mxu0 %v256_v9 }
  0x41   :  { %164 = vmatprep.subr.bf16.mxu0 %v257_v10 }
  0x48   :  { %165 = vmatpush1.bf16.xpose.msra.mxu0 %v259_v11 }
  0x49   :  { %166 = vmatprep.subr.bf16.mxu0 %v260_v12 }
  0x50   :  { %167 = vmatpush1.bf16.xpose.msra.mxu0 %v262_v13 }
  0x51   :  { %168 = vmatprep.subr.bf16.mxu0 %v263_v14 }
  0x58   :  { %169 = vmatpush1.bf16.xpose.msra.mxu0 %v265_v15 }
  0x59   :  { %170 = vmatprep.subr.bf16.mxu0 %v266_v16 }
  0x60   :  { %171 = vmatpush1.bf16.xpose.msra.mxu0 %v268_v17 }
  0xa7   :  { %v53_v20 = vpop.permute.xlu0 %52 }
  0xa8   :  { %v55_v21 = vmul.f32 %v53_v20, %v47_v18  ;;  %v56_v22 = vmul.f32 %v53_v20, %v48_v19 }
  0xaa   :  { %v57_v23 = vpack.c.bf16 %v55_v21, %v55_v21  ;;  %v58_v24 = vpack.c.bf16 %v56_v22, %v56_v22 }
  0xac   :  { %188 = vmatprep.mubr.bf16.mxu0 %v58_v24 }
  0xad   :  { %189 = vmatmul.mubr.bf16.vlgmr.msra.gmra.mrb[0].mxu0 %v57_v23 }
 0x180   :  { %v190_v25 = vpop.f32.mrb[0].mxu0 }
 0x181   :  { %v237_v26 = vclamps-f32 %v190_v25, 1.0  ;;  %v192_v27 = vpop.f32.mrb[1].mxu0 }
 0x182   :  { %v193_v28 = vpop.f32.mrb[2].mxu0 }
 0x183   :  { %204 = vst [vmem:[#allocation8] sm:$0xff] %v237_v26  ;;  %v194_v29 = vpop.f32.mrb[3].mxu0 }
 0x184   :  { %324 = shalt.err (!%p321_p6)
}
 0x185   :  { %s325_s15 = scalar_lea.hbm %s416_s3, 128 }
 0x186   :  { %p326_p7 = scmp.ne.s32.totalorder %s416_s3, %s325_s15  ;;  %p329_p8 = scmp.lt.u32.totalorder %s325_s15, %s416_s3 }
 0x188   :  { %p331_p9 = pnand %p329_p8, %p326_p7 }
 0x18a   :  { %334 = shalt.err (!%p331_p9)
}
 0x18b   :  { %214 = dma.vmem_to_hbm [thread:$0]  %s212_s2, 128, %s416_s3, [#allocation5]  }
 0x18c   :  { %339 = dma.done.wait [#allocation5], 128  }
 0x18d   :  { %340 = vsyncadd [#allocation5], 4294967168 }
 0x18e   :  { %218 = vsyncpa [#allocation4], 1 }
 0x18f   :  { %219 = vsyncpa [#allocation7], 1 }
 0x190   :  { %220 = vsyncpa [#allocation5], 1 }

</bundles_post_ra>
